<compile_context>
chip_gen: v7x
topology: tpu7x:2x2x1
jax: 0.10.0
libtpu: 0.0.40
codegen_flags: <defaults>
</compile_context>

<pallas_src>
import math

import jax
import jax.numpy as jnp
from jax import lax
from jax.experimental import pallas as pl
from jax.experimental.pallas import tpu as pltpu

_INV_SQRT2 = 1.0 / math.sqrt(2.0)


def _pgelu_kernel(x_ref, a_ref, b_ref, o_ref):
    # x: (TR, W) in caller dtype; compute in f32 (v5e VPU/EUP have no bf16 path).
    x = x_ref[...].astype(jnp.float32)
    a = a_ref[...]                      # (1, W) f32 = (w1 - w2), broadcast over rows
    b = b_ref[...]                      # (1, W) f32 = w2
    # Exact GELU: 0.5 * x * (1 + erf(x / sqrt(2)))  -- matches nn.GELU()
    gelu = 0.5 * x * (1.0 + lax.erf(x * jnp.float32(_INV_SQRT2)))
    o_ref[...] = (a * gelu + b * x).astype(o_ref.dtype)


def pgelu(x, weight_1, weight_2, *, max_lane_width=4096, target_block_bytes=2 * 1024 * 1024):
    """PGELU: (w1 - w2) * GELU(x) + w2 * x, weights broadcast over the last dim."""
    orig_shape = x.shape
    orig_dtype = x.dtype
    C = orig_shape[-1]
    n = x.size
    rows = n // C

    # ---- lane-dense 2-D view ------------------------------------------------
    # Width must be a multiple of C (weight broadcast period). Prefer a multiple
    # of 128 (dense, unmasked vector stores) and reasonably wide.
    k = 1
    k128 = 128 // math.gcd(C, 128)      # smallest k with (k*C) % 128 == 0
    if rows % k128 == 0 and k128 * C <= max_lane_width:
        k = k128
        while rows % (2 * k) == 0 and 2 * k * C <= max_lane_width:
            k *= 2
    lane_w = k * C
    n_rows = rows // k
    x2 = x.reshape(n_rows, lane_w)      # contiguous reshape: layout no-op

    # ---- weights: precompute a = (w1 - w2), b = w2; tile k times ------------
    w1 = jnp.broadcast_to(weight_1.astype(jnp.float32).reshape(-1), (C,))
    w2 = jnp.broadcast_to(weight_2.astype(jnp.float32).reshape(-1), (C,))
    a = jnp.tile(w1 - w2, (k,)).reshape(1, lane_w)
    b = jnp.tile(w2, (k,)).reshape(1, lane_w)

    # ---- row tile: ~target_block_bytes per block, multiple of 8 -------------
    itemsize = jnp.dtype(orig_dtype).itemsize
    tile_r = max(8, (target_block_bytes // (lane_w * itemsize)) // 8 * 8)
    tile_r = min(tile_r, n_rows)        # full-dim block allowed even if < 8
    grid = (pl.cdiv(n_rows, tile_r),)   # partial last block handled by Pallas

    out2 = pl.pallas_call(
        _pgelu_kernel,
        out_shape=jax.ShapeDtypeStruct((n_rows, lane_w), orig_dtype),
        grid_spec=pltpu.PrefetchScalarGridSpec(
            num_scalar_prefetch=0,
            grid=grid,
            in_specs=[
                pl.BlockSpec((tile_r, lane_w), lambda i: (i, 0)),
                pl.BlockSpec((1, lane_w), lambda i: (0, 0)),
                pl.BlockSpec((1, lane_w), lambda i: (0, 0)),
            ],
            out_specs=pl.BlockSpec((tile_r, lane_w), lambda i: (i, 0)),
        ),
        compiler_params=pltpu.CompilerParams(
            dimension_semantics=("parallel",),
            vmem_limit_bytes=32 * 1024 * 1024,   # explicit for v5e's 16 MiB default
        ),
    )(x2, a, b)

    return out2.reshape(orig_shape)


def _pgelu_ref(x, w1, w2):
    xf = x.astype(jnp.float32)
    g = jax.nn.gelu(xf, approximate=False)
    w1f = w1.astype(jnp.float32)
    w2f = w2.astype(jnp.float32)
    return (w1f - w2f) * g + w2f * xf


if __name__ == "__main__":
    key = jax.random.PRNGKey(0)
    kx, kw1, kw2, kx2 = jax.random.split(key, 4)

    # ---- per-channel weights, f32 input: (2, 4, 16, 32), num_parameters = 32
    B, H, W, C = 2, 4, 16, 32
    x = jax.random.normal(kx, (B, H, W, C), dtype=jnp.float32)
    # Module init fills both weights with weight_init (=0.5), which zeroes the GELU
    # coefficient; use deterministic random per-channel values so the GELU path runs.
    weight_1 = 0.5 + 0.1 * jax.random.normal(kw1, (C,), dtype=jnp.float32)
    weight_2 = 0.5 + 0.1 * jax.random.normal(kw2, (C,), dtype=jnp.float32)

    out = jax.block_until_ready(pgelu(x, weight_1, weight_2))
    ref = _pgelu_ref(x, weight_1, weight_2)
    assert out.shape == x.shape and out.dtype == x.dtype
    assert jnp.allclose(out, ref, atol=1e-5, rtol=1e-5), float(jnp.max(jnp.abs(out - ref)))

    # ---- scalar weights (num_parameters=1), odd leading shape (k=1 fallback path)
    x_odd = jax.random.normal(kx2, (3, 7, C), dtype=jnp.float32)
    w1s = jnp.array([0.3], dtype=jnp.float32)
    w2s = jnp.array([0.7], dtype=jnp.float32)
    out_odd = jax.block_until_ready(pgelu(x_odd, w1s, w2s))
    ref_odd = _pgelu_ref(x_odd, w1s, w2s)
    assert out_odd.shape == x_odd.shape and out_odd.dtype == x_odd.dtype
    assert jnp.allclose(out_odd, ref_odd, atol=1e-5, rtol=1e-5)

    # ---- bf16 input: output stays bf16, no host-side up/down-cast passes
    x_bf = x.astype(jnp.bfloat16)
    out_bf = jax.block_until_ready(pgelu(x_bf, weight_1, weight_2))
    assert out_bf.dtype == jnp.bfloat16 and out_bf.shape == x_bf.shape
    ref_bf = _pgelu_ref(x_bf, weight_1, weight_2)   # f32 reference
    assert jnp.allclose(out_bf.astype(jnp.float32), ref_bf, atol=5e-2, rtol=5e-2)

    print("KERNEL_OK")
</pallas_src>

<mosaic_0001>
module attributes {stable_mosaic.version = 11 : i64} {
  func.func @_pgelu_kernel(%arg0: i32, %arg1: memref<1x4096xf32, #tpu.memory_space<vmem>>, %arg2: memref<1x4096xf32, #tpu.memory_space<vmem>>, %arg3: memref<1x4096xf32, #tpu.memory_space<vmem>>, %arg4: memref<1x4096xf32, #tpu.memory_space<vmem>>) attributes {dimension_semantics = [#tpu.dimension_semantics<parallel>], iteration_bounds = array<i64: 1>, scalar_prefetch = 0 : i64, scratch_operands = 0 : i64, tpu.core_type = #tpu.core_type<tc>, window_params = [{transform_indices = @transform_0, window_bounds = array<i64: 1, 4096>}, {pipeline_mode = #tpu.pipeline_mode<synchronous>, transform_indices = @transform_1, window_bounds = array<i64: 1, 4096>}, {pipeline_mode = #tpu.pipeline_mode<synchronous>, transform_indices = @transform_2, window_bounds = array<i64: 1, 4096>}, {transform_indices = @transform_3, window_bounds = array<i64: 1, 4096>}]} {
    %c0 = arith.constant 0 : index
    %c0_0 = arith.constant 0 : index
    %0 = vector.load %arg1[%c0, %c0_0] : memref<1x4096xf32, #tpu.memory_space<vmem>>, vector<1x4096xf32>
    %c0_1 = arith.constant 0 : index
    %c0_2 = arith.constant 0 : index
    %1 = vector.load %arg2[%c0_1, %c0_2] : memref<1x4096xf32, #tpu.memory_space<vmem>>, vector<1x4096xf32>
    %c0_3 = arith.constant 0 : index
    %c0_4 = arith.constant 0 : index
    %2 = vector.load %arg3[%c0_3, %c0_4] : memref<1x4096xf32, #tpu.memory_space<vmem>>, vector<1x4096xf32>
    %cst = arith.constant 5.000000e-01 : f32
    %3 = vector.broadcast %cst : f32 to vector<1x4096xf32>
    %4 = arith.mulf %3, %0 : vector<1x4096xf32>
    %cst_5 = arith.constant 0.707106769 : f32
    %5 = vector.broadcast %cst_5 : f32 to vector<1x4096xf32>
    %6 = arith.mulf %0, %5 : vector<1x4096xf32>
    %7 = math.erf %6 : vector<1x4096xf32>
    %cst_6 = arith.constant 1.000000e+00 : f32
    %8 = vector.broadcast %cst_6 : f32 to vector<1x4096xf32>
    %9 = arith.addf %8, %7 : vector<1x4096xf32>
    %10 = arith.mulf %4, %9 : vector<1x4096xf32>
    %11 = arith.mulf %1, %10 : vector<1x4096xf32>
    %12 = arith.mulf %2, %0 : vector<1x4096xf32>
    %13 = arith.addf %11, %12 : vector<1x4096xf32>
    %c0_7 = arith.constant 0 : index
    %c0_8 = arith.constant 0 : index
    %14 = vector.load %arg4[%c0_7, %c0_8] : memref<1x4096xf32, #tpu.memory_space<vmem>>, vector<1x4096xf32>
    tpu.vector_store %arg4[%c0_7, %c0_8], %13 {strides = array<i32>} : memref<1x4096xf32, #tpu.memory_space<vmem>>, vector<1x4096xf32>,
    return
  }
  func.func @transform_0(%arg0: i32) -> (i32, i32) {
    %c0_i32 = arith.constant 0 : i32
    %c0_i32_0 = arith.constant 0 : i32
    return %arg0, %c0_i32 : i32, i32
  }
  func.func @transform_1(%arg0: i32) -> (i32, i32) {
    %c0_i32 = arith.constant 0 : i32
    %c0_i32_0 = arith.constant 0 : i32
    %c0_i32_1 = arith.constant 0 : i32
    return %c0_i32, %c0_i32_0 : i32, i32
  }
  func.func @transform_2(%arg0: i32) -> (i32, i32) {
    %c0_i32 = arith.constant 0 : i32
    %c0_i32_0 = arith.constant 0 : i32
    %c0_i32_1 = arith.constant 0 : i32
    return %c0_i32, %c0_i32_0 : i32, i32
  }
  func.func @transform_3(%arg0: i32) -> (i32, i32) {
    %c0_i32 = arith.constant 0 : i32
    %c0_i32_0 = arith.constant 0 : i32
    return %arg0, %c0_i32 : i32, i32
  }
}

</mosaic_0001>

<bundles_post_ra>
// kernel: tpu_custom_call.1
= control target key start
LH: loop header
LB: loop body
LE: loop exit
PB: predicated region body
PF: predicated region fallthrough
CT: control target
= control target key end

     0   :  { %8 = vsyncpa [#allocation3], 0  ;;  %s292_s0 = inlined_call_operand.hbm [shape: f32[1,4096], index: 0, kind: input, shape index: {}]   ;;  %s293_s1 = inlined_call_operand.hbm [shape: f32[1,4096], index: 1, kind: input, shape index: {}]   ;;  %s294_s2 = inlined_call_operand.hbm [shape: f32[1,4096], index: 2, kind: input, shape index: {}]   ;;  %s295_s3 = inlined_call_operand.hbm [shape: f32[1,4096], index: 3, kind: output, shape index: {}]  }
   0x1   :  { %9 = vsyncpa [#allocation6], 0 }
   0x2   :  { %10 = vsyncpa [#allocation4], 0  ;;  %s220_s12 = smov [#allocation5]   ;;  %s221_s14 = smov [#allocation2]  }
   0x3   :  { %s27_s13 = sshll.u32 %s220_s12, 4  ;;  %s17_s15 = sshll.u32 %s221_s14, 4  ;;  %s28_s13 = int_to_ptr.vmem [resolvable:$true] %s27_s13  ;;  %s18_s15 = int_to_ptr.vmem [resolvable:$true] %s17_s15 }
   0x4   :  { %s126_s18 = scalar_lea.hbm %s293_s1, 512 }
   0x5   :  { %p127_p0 = scmp.ne.s32.totalorder %s293_s1, %s126_s18  ;;  %p130_p1 = scmp.lt.u32.totalorder %s126_s18, %s293_s1 }
   0x7   :  { %p132_p2 = pnand %p130_p1, %p127_p0 }
   0x9   :  { %135 = shalt.err (!%p132_p2)
}
   0xa   :  { %s136_s23 = scalar_lea.vmem %s28_s13, 512  ;;  %p141_p4 = scmp.lt.s32.totalorder %s28_s13, %s28_s13 }
   0xb   :  { %p137_p3 = scmp.ne.s32.totalorder %s28_s13, %s136_s23  ;;  %p142_p5 = scmp.lt.s32.totalorder %s136_s23, %s136_s23 }
   0xd   :  { %p143_p6 = por %p142_p5, %p141_p4 }
   0xf   :  { %p144_p7 = pnand %p143_p6, %p137_p3 }
  0x11   :  { %147 = shalt.err (!%p144_p7)
}
  0x12   :  { %30 = dma.hbm_to_vmem [thread:$0]  %s293_s1, 512, %s28_s13, [#allocation6]  }
  0x13   :  { %s148_s28 = scalar_lea.hbm %s292_s0, 512 }
  0x14   :  { %p149_p8 = scmp.ne.s32.totalorder %s292_s0, %s148_s28  ;;  %p152_p9 = scmp.lt.u32.totalorder %s148_s28, %s292_s0 }
  0x16   :  { %p154_p10 = pnand %p152_p9, %p149_p8 }
  0x18   :  { %157 = shalt.err (!%p154_p10)
}
  0x19   :  { %s158_s6 = scalar_lea.vmem %s18_s15, 512  ;;  %p163_p12 = scmp.lt.s32.totalorder %s18_s15, %s18_s15 }
  0x1a   :  { %p159_p11 = scmp.ne.s32.totalorder %s18_s15, %s158_s6  ;;  %p164_p13 = scmp.lt.s32.totalorder %s158_s6, %s158_s6 }
  0x1c   :  { %p165_p0 = por %p164_p13, %p163_p12 }
  0x1e   :  { %p166_p1 = pnand %p165_p0, %p159_p11 }
  0x20   :  { %169 = shalt.err (!%p166_p1)
}
  0x21   :  { %20 = dma.hbm_to_vmem [thread:$0]  %s292_s0, 512, %s18_s15, [#allocation3]  }
  0x22   :  { %s222_s8 = smov [#allocation7]   ;;  %s170_s12 = scalar_lea.hbm %s294_s2, 512 }
  0x23   :  { %s37_s9 = sshll.u32 %s222_s8, 4  ;;  %p171_p2 = scmp.ne.s32.totalorder %s294_s2, %s170_s12  ;;  %s38_s9 = int_to_ptr.vmem [resolvable:$true] %s37_s9 }
  0x24   :  { %p174_p3 = scmp.lt.u32.totalorder %s170_s12, %s294_s2 }
  0x26   :  { %p176_p4 = pnand %p174_p3, %p171_p2 }
  0x28   :  { %179 = shalt.err (!%p176_p4)
}
  0x29   :  { %s180_s18 = scalar_lea.vmem %s38_s9, 512  ;;  %p185_p6 = scmp.lt.s32.totalorder %s38_s9, %s38_s9 }
  0x2a   :  { %p181_p5 = scmp.ne.s32.totalorder %s38_s9, %s180_s18  ;;  %p186_p7 = scmp.lt.s32.totalorder %s180_s18, %s180_s18 }
  0x2c   :  { %p187_p8 = por %p186_p7, %p185_p6 }
  0x2e   :  { %p188_p9 = pnand %p187_p8, %p181_p5 }
  0x30   :  { %191 = shalt.err (!%p188_p9)
}
  0x31   :  { %40 = dma.hbm_to_vmem [thread:$0]  %s294_s2, 512, %s38_s9, [#allocation6]  }
  0x32   :  { %214 = dma.done.wait [#allocation3], 512  }
  0x33   :  { %215 = vsyncadd [#allocation3], 4294966784 }
  0x34   :  { %216 = dma.done.wait [#allocation6], 1024  }
  0x35   :  { %217 = vsyncadd [#allocation6], 4294966272  ;;  %v50_v0 = vld [vmem:[#allocation2] sm:$0xff]  ;;  %v51_v2 = vld [vmem:[#allocation2 + $0x8] sm:$0xff]  ;;  %s223_s2 = smov [#allocation8]  }
  0x36   :  { %v66_v1 = vmul.f32 0.70710677, %v50_v0  ;;  %v67_v3 = vmul.f32 0.70710677, %v51_v2  ;;  %v52_v4 = vld [vmem:[#allocation2 + $0x10] sm:$0xff]  ;;  %v53_v6 = vld [vmem:[#allocation2 + $0x18] sm:$0xff] }
  0x37   :  { %v68_v5 = vmul.f32 0.70710677, %v52_v4  ;;  %v69_v7 = vmul.f32 0.70710677, %v53_v6  ;;  %v62_v8 = vmul.f32 0.5, %v50_v0  ;;  %v58_v10 = vld [vmem:[#allocation7] sm:$0xff] }
  0x38   :  { %118 = verf.f32 %v66_v1  ;;  %v63_v11 = vmul.f32 0.5, %v51_v2  ;;  %v59_v14 = vld [vmem:[#allocation7 + $0x8] sm:$0xff]  ;;  %v64_v15 = vmul.f32 0.5, %v52_v4  ;;  %v54_v17 = vld [vmem:[#allocation5] sm:$0xff]  ;;  %v60_v19 = vld [vmem:[#allocation7 + $0x10] sm:$0xff]  ;;  %v65_v20 = vmul.f32 0.5, %v53_v6 }
  0x39   :  { %120 = verf.f32 %v67_v3  ;;  %v86_v23 = vmul.f32 %v58_v10, %v50_v0  ;;  %v55_v24 = vld [vmem:[#allocation5 + $0x8] sm:$0xff]  ;;  %v61_v26 = vld [vmem:[#allocation7 + $0x18] sm:$0xff]  ;;  %v87_v28 = vmul.f32 %v59_v14, %v51_v2  ;;  %v56_v29 = vld [vmem:[#allocation5 + $0x10] sm:$0xff]  ;;  %v88_v33 = vmul.f32 %v60_v19, %v52_v4  ;;  %s104_s19 = sshll.u32 %s223_s2, 4  ;;  %s105_s19 = int_to_ptr.vmem [resolvable:$true] %s104_s19 }
  0x3a   :  { %122 = verf.f32 %v68_v5  ;;  %v57_v34 = vld [vmem:[#allocation5 + $0x18] sm:$0xff]  ;;  %v89_v37 = vmul.f32 %v61_v26, %v53_v6  ;;  %s192_s20 = scalar_lea.vmem %s105_s19, 512  ;;  %p197_p11 = scmp.lt.s32.totalorder %s105_s19, %s105_s19 }
  0x3b   :  { %124 = verf.f32 %v69_v7  ;;  %p193_p10 = scmp.ne.s32.totalorder %s105_s19, %s192_s20  ;;  %p198_p12 = scmp.lt.s32.totalorder %s192_s20, %s192_s20 }
  0x3d   :  { %p199_p13 = por %p198_p12, %p197_p11 }
  0x3f   :  { %p200_p0 = pnand %p199_p13, %p193_p10 }
  0x42   :  { %v119_v9 = vpop.eup %118 }
  0x43   :  { %v121_v12 = vpop.eup %120  ;;  %v74_v13 = vadd.f32 1.0, %v119_v9 }
  0x44   :  { %v123_v16 = vpop.eup %122  ;;  %v75_v18 = vadd.f32 1.0, %v121_v12 }
  0x45   :  { %v125_v21 = vpop.eup %124  ;;  %v78_v22 = vmul.f32 %v74_v13, %v62_v8  ;;  %v76_v25 = vadd.f32 1.0, %v123_v16 }
  0x46   :  { %v79_v27 = vmul.f32 %v75_v18, %v63_v11  ;;  %v77_v30 = vadd.f32 1.0, %v125_v21 }
  0x47   :  { %v82_v31 = vmul.f32 %v78_v22, %v54_v17  ;;  %v80_v32 = vmul.f32 %v76_v25, %v64_v15 }
  0x48   :  { %v83_v35 = vmul.f32 %v79_v27, %v55_v24  ;;  %v81_v36 = vmul.f32 %v77_v30, %v65_v20 }
  0x49   :  { %v90_v38 = vadd.f32 %v86_v23, %v82_v31  ;;  %v84_v39 = vmul.f32 %v80_v32, %v56_v29 }
  0x4a   :  { %v91_v40 = vadd.f32 %v87_v28, %v83_v35  ;;  %v85_v41 = vmul.f32 %v81_v36, %v57_v34 }
  0x4b   :  { %94 = vst [vmem:[#allocation8] sm:$0xff] %v90_v38  ;;  %v92_v42 = vadd.f32 %v88_v33, %v84_v39 }
  0x4c   :  { %95 = vst [vmem:[#allocation8 + $0x8] sm:$0xff] %v91_v40  ;;  %v93_v43 = vadd.f32 %v89_v37, %v85_v41 }
  0x4d   :  { %96 = vst [vmem:[#allocation8 + $0x10] sm:$0xff] %v92_v42 }
  0x4e   :  { %97 = vst [vmem:[#allocation8 + $0x18] sm:$0xff] %v93_v43 }
  0x4f   :  { %203 = shalt.err (!%p200_p0)
}
  0x50   :  { %s204_s23 = scalar_lea.hbm %s295_s3, 512 }
  0x51   :  { %p205_p1 = scmp.ne.s32.totalorder %s295_s3, %s204_s23  ;;  %p208_p2 = scmp.lt.u32.totalorder %s204_s23, %s295_s3 }
  0x53   :  { %p210_p3 = pnand %p208_p2, %p205_p1 }
  0x55   :  { %213 = shalt.err (!%p210_p3)
}
  0x56   :  { %107 = dma.vmem_to_hbm [thread:$0]  %s105_s19, 512, %s295_s3, [#allocation4]  }
  0x57   :  { %218 = dma.done.wait [#allocation4], 512  }
  0x58   :  { %219 = vsyncadd [#allocation4], 4294966784 }
  0x59   :  { %111 = vsyncpa [#allocation3], 1 }
  0x5a   :  { %112 = vsyncpa [#allocation6], 1 }
  0x5b   :  { %113 = vsyncpa [#allocation4], 1 }

</bundles_post_ra>
